<compile_context>
chip_gen: v7x
topology: tpu7x:2x2x1
jax: 0.10.0
libtpu: 0.0.40
codegen_flags: <defaults>
</compile_context>

<pallas_src>
import jax
import jax.numpy as jnp
from jax.experimental import pallas as pl
from jax.experimental.pallas import tpu as pltpu


def _round_up(x, m):
    return ((x + m - 1) // m) * m


def _cdiv(a, b):
    return (a + b - 1) // b


def _const_spec(shape):
    """BlockSpec for an operand whose block index never changes.

    Single-buffered (double-buffering a constant window only burns VMEM);
    falls back to a default BlockSpec if pipeline_mode/Buffered is unavailable.
    """
    idx = lambda i, k: (0, 0)
    try:
        return pl.BlockSpec(shape, idx, pipeline_mode=pl.Buffered(1))
    except (TypeError, AttributeError):
        return pl.BlockSpec(shape, idx)


def _nos_mlp_kernel(x_ref, w6_ref, b6_ref, w7_ref, b7_ref, wp_ref, bp_ref,
                    out_ref, acc_ref):
    """Fused nos_head (fc6+relu, fc7+relu) + nos_predictor.

    Grid = (M tiles of ROIs, K tiles of the fc6 contraction). fc6 accumulates
    into an f32 VMEM scratch across the K axis (bias folded into the init);
    fc7 + predictor run once on the last K step. MXU operands are bf16, VPU
    work (bias, ReLU) stays f32.
    """
    k = pl.program_id(1)

    @pl.when(k == 0)
    def _():
        # Fold the fc6 bias into the accumulator init (saves one f32 add).
        acc_ref[...] = jnp.broadcast_to(b6_ref[...], acc_ref.shape)

    acc_ref[...] += jnp.dot(x_ref[...], w6_ref[...],
                            preferred_element_type=jnp.float32)

    @pl.when(k == pl.num_programs(1) - 1)
    def _():
        h = jnp.maximum(acc_ref[...], 0.0)                       # fc6 + ReLU (f32)
        h = jnp.dot(h.astype(w7_ref.dtype), w7_ref[...],
                    preferred_element_type=jnp.float32)
        h = jnp.maximum(h + b7_ref[...], 0.0)                    # fc7 + ReLU (f32)
        nos = jnp.dot(h.astype(wp_ref.dtype), wp_ref[...],
                      preferred_element_type=jnp.float32)        # lane-dense 128 wide
        out_ref[...] = (nos + bp_ref[...]).astype(out_ref.dtype)


def prepare_nos_params(params, *, compute_dtype=jnp.bfloat16, tile_m=512,
                       tile_k=None, out_pad=128):
    """One-time cast/pad of the static weights (hoisted out of the hot path).

    Weights are stored transposed as (in, out) so the kernel computes
    y = x @ W + b (== PyTorch's y = x @ W_pt.T + b). Also picks the fc6 K tile
    from a generation-aware VMEM budget.
    """
    f_in, hidden = params["w6"].shape
    itemsize = jnp.dtype(compute_dtype).itemsize

    try:
        vmem_cap = int(pltpu.get_tpu_info().vmem_capacity_bytes)
    except Exception:  # conservative fallback (v7x-sized VMEM)
        vmem_cap = 64 * 1024 * 1024
    # <=48 MiB scoped limit on v7x (64 MiB physical/TC), up to 96 MiB on v5e/v6e.
    vmem_limit = min((vmem_cap * 3) // 4, 96 * 1024 * 1024)
    budget = int(vmem_limit * 0.8)

    tm_hi = _round_up(max(tile_m, 8), 8)
    f_in_128 = _round_up(f_in, 128)
    tk = f_in_128 if tile_k is None else _round_up(min(tile_k, f_in_128), 128)

    def footprint(tk_):
        return (2 * tm_hi * tk_ * itemsize          # x tile (double-buffered)
                + 2 * tk_ * hidden * itemsize       # W6 K-slab (double-buffered)
                + hidden * hidden * itemsize        # W7 (single-buffered)
                + hidden * out_pad * itemsize       # Wp (single-buffered)
                + 2 * tm_hi * out_pad * 4           # output tile
                + tm_hi * hidden * 4)               # f32 fc6 accumulator

    while footprint(tk) > budget and tk > 128:
        tk = max(128, _round_up(tk // 2, 128))

    num_k = _cdiv(f_in_128, tk)
    f_in_pad = num_k * tk

    cd = compute_dtype
    w6 = jnp.pad(params["w6"].astype(cd), ((0, f_in_pad - f_in), (0, 0)))
    w7 = params["w7"].astype(cd)
    wp = jnp.pad(params["wp"].astype(cd), ((0, 0), (0, out_pad - 1)))
    b6 = params["b6"].reshape(1, hidden).astype(jnp.float32)
    b7 = params["b7"].reshape(1, hidden).astype(jnp.float32)
    bp = jnp.pad(params["bp"].reshape(1, 1).astype(jnp.float32),
                 ((0, 0), (0, out_pad - 1)))

    return {"w6": w6, "w7": w7, "wp": wp, "b6": b6, "b7": b7, "bp": bp,
            "f_in": f_in, "f_in_pad": f_in_pad, "hidden": hidden,
            "tk": tk, "num_k": num_k, "out_pad": out_pad,
            "tile_m": tm_hi, "vmem_limit": vmem_limit, "compute_dtype": cd}


def nos_head_predictor_forward(roi_feats, prepared, boxes_per_image):
    """Runs nos_head + nos_predictor on pooled ROI features.

    roi_feats: (N, C, 7, 7) float32 (any N; padded internally).
    Returns a list of per-image (n_i, 1) float32 arrays (== nos.split(...)).
    """
    n_rois = roi_feats.shape[0]
    x = roi_feats.reshape(n_rois, -1)            # flatten(start_dim=1)
    f_in = prepared["f_in"]
    assert x.shape[1] == f_in, (x.shape, f_in)

    hidden = prepared["hidden"]
    out_pad = prepared["out_pad"]
    tk = prepared["tk"]
    num_k = prepared["num_k"]
    f_in_pad = prepared["f_in_pad"]
    cd = prepared["compute_dtype"]
    tile_m = prepared["tile_m"]

    # Adaptive M tiling: fewest M tiles (least W6 re-streaming) while matching
    # tm to n_rois so padded rows stay a few percent; keep num_m >= 2 when
    # there is enough work so the parallel M axis shards across v7x's 2 TCs.
    num_m = _cdiv(n_rois, tile_m)
    if n_rois >= 16:
        num_m = max(num_m, 2)
    tm = _round_up(_cdiv(n_rois, num_m), 8)
    m_pad = tm * num_m

    # Single fused pad (+cast) of the activations; zero padding is math-neutral.
    x_p = jnp.pad(x.astype(cd), ((0, m_pad - n_rois), (0, f_in_pad - f_in)))

    itemsize = jnp.dtype(cd).itemsize
    flops = 2 * m_pad * (f_in_pad * hidden + hidden * hidden + hidden * out_pad)
    bytes_accessed = (x_p.size * itemsize                       # activations once
                      + num_m * prepared["w6"].size * itemsize  # W6 per M tile (dominant)
                      + (prepared["w7"].size + prepared["wp"].size) * itemsize
                      + (2 * hidden + 2 * out_pad) * 4          # biases
                      + m_pad * out_pad * 4)                    # output

    out = pl.pallas_call(
        _nos_mlp_kernel,
        out_shape=jax.ShapeDtypeStruct((m_pad, out_pad), jnp.float32),
        grid_spec=pltpu.PrefetchScalarGridSpec(
            num_scalar_prefetch=0,
            grid=(num_m, num_k),                               # reduction (K) last
            in_specs=[
                pl.BlockSpec((tm, tk), lambda i, k: (i, k)),       # x tile
                pl.BlockSpec((tk, hidden), lambda i, k: (k, 0)),   # W6 K-slab
                _const_spec((1, hidden)),                          # b6
                _const_spec((hidden, hidden)),                     # W7 (resident)
                _const_spec((1, hidden)),                          # b7
                _const_spec((hidden, out_pad)),                    # Wp (lane padded)
                _const_spec((1, out_pad)),                         # bp (lane padded)
            ],
            out_specs=pl.BlockSpec((tm, out_pad), lambda i, k: (i, 0)),
            scratch_shapes=[pltpu.VMEM((tm, hidden), jnp.float32)],  # fc6 acc
        ),
        compiler_params=pltpu.CompilerParams(
            dimension_semantics=("parallel", "arbitrary"),
            vmem_limit_bytes=int(prepared["vmem_limit"])),
        cost_estimate=pl.CostEstimate(
            flops=int(flops), transcendentals=0,
            bytes_accessed=int(bytes_accessed)),
    )(x_p, prepared["w6"], prepared["b6"], prepared["w7"], prepared["b7"],
      prepared["wp"], prepared["bp"])

    nos = out[:n_rois, :1]                       # drop M padding + lane padding

    # nos_predictor: split predictions per image (boxes_per_image).
    splits, start = [], 0
    for n in boxes_per_image:
        splits.append(nos[start:start + n])
        start += n
    return splits


def init_nos_params(key, in_features, representation_size):
    """Deterministic init mirroring nn.Linear default (uniform +-1/sqrt(fan_in)).

    Weights are stored as (in, out) = PyTorch weight transposed.
    """
    ks = jax.random.split(key, 6)

    def lin(kw, kb, fan_in, fan_out):
        bound = 1.0 / jnp.sqrt(jnp.float32(fan_in))
        w = jax.random.uniform(kw, (fan_in, fan_out), jnp.float32, -bound, bound)
        b = jax.random.uniform(kb, (1, fan_out), jnp.float32, -bound, bound)
        return w, b

    w6, b6 = lin(ks[0], ks[1], in_features, representation_size)          # fc6
    w7, b7 = lin(ks[2], ks[3], representation_size, representation_size)  # fc7
    wp, bp = lin(ks[4], ks[5], representation_size, 1)                    # nos_predict_end
    return {"w6": w6, "b6": b6, "w7": w7, "b7": b7, "wp": wp, "bp": bp}


def _reference_forward(roi_feats, params, boxes_per_image,
                       compute_dtype=jnp.bfloat16):
    """Plain-JAX reference (bf16 MXU operands, f32 accumulation — mirrors kernel)."""
    x = roi_feats.reshape(roi_feats.shape[0], -1).astype(compute_dtype)
    h = jnp.dot(x, params["w6"].astype(compute_dtype),
                preferred_element_type=jnp.float32) + params["b6"]
    h = jnp.maximum(h, 0.0)
    h = jnp.dot(h.astype(compute_dtype), params["w7"].astype(compute_dtype),
                preferred_element_type=jnp.float32) + params["b7"]
    h = jnp.maximum(h, 0.0)
    nos = jnp.dot(h.astype(compute_dtype), params["wp"].astype(compute_dtype),
                  preferred_element_type=jnp.float32) + params["bp"]
    out, start = [], 0
    for n in boxes_per_image:
        out.append(nos[start:start + n])
        start += n
    return out


if __name__ == "__main__":
    # Small stand-ins for the real module:
    #   backbone.out_channels 256 -> 16, representation_size 1024 -> 128,
    #   MultiScaleRoIAlign output_size = 7 (kept).
    key = jax.random.PRNGKey(0)
    k_feat, k_par = jax.random.split(key)

    C, RES, REPR = 16, 7, 128
    boxes_per_image = [70, 90]            # 2 images, 160 ROIs total
    n_rois = sum(boxes_per_image)

    roi_feats = jax.random.normal(k_feat, (n_rois, C, RES, RES), jnp.float32)
    params = init_nos_params(k_par, C * RES * RES, REPR)

    # tile_m=128 -> 2 adaptive M tiles (tm=80); tile_k=256 -> 4 K tiles
    # (exercises adaptive M tiling, K accumulation and K/lane padding).
    prepared = prepare_nos_params(params, tile_m=128, tile_k=256)

    nos_list = nos_head_predictor_forward(roi_feats, prepared, boxes_per_image)
    nos_list = [jax.block_until_ready(n) for n in nos_list]

    ref_list = _reference_forward(roi_feats, params, boxes_per_image)
    for got, ref, n in zip(nos_list, ref_list, boxes_per_image):
        assert got.shape == (n, 1)
        err = float(jnp.max(jnp.abs(got - ref)))
        assert jnp.allclose(got, ref, atol=1e-2, rtol=1e-2), err

    print("KERNEL_OK")
</pallas_src>

<mosaic_0001>
module attributes {stable_mosaic.version = 11 : i64} {
  func.func @_nos_mlp_kernel(%arg0: i32, %arg1: i32, %arg2: memref<80x256xbf16, #tpu.memory_space<vmem>>, %arg3: memref<256x128xbf16, #tpu.memory_space<vmem>>, %arg4: memref<1x128xf32, #tpu.memory_space<vmem>>, %arg5: memref<128x128xbf16, #tpu.memory_space<vmem>>, %arg6: memref<1x128xf32, #tpu.memory_space<vmem>>, %arg7: memref<128x128xbf16, #tpu.memory_space<vmem>>, %arg8: memref<1x128xf32, #tpu.memory_space<vmem>>, %arg9: memref<80x128xf32, #tpu.memory_space<vmem>>, %arg10: memref<80x128xf32, #tpu.memory_space<vmem>>) attributes {dimension_semantics = [#tpu.dimension_semantics<parallel>, #tpu.dimension_semantics<arbitrary>], iteration_bounds = array<i64: 2, 4>, scalar_prefetch = 0 : i64, scratch_operands = 1 : i64, tpu.core_type = #tpu.core_type<tc>, window_params = [{transform_indices = @transform_0, window_bounds = array<i64: 80, 256>}, {transform_indices = @transform_1, window_bounds = array<i64: 256, 128>}, {pipeline_mode = #tpu.pipeline_mode<synchronous>, transform_indices = @transform_2, window_bounds = array<i64: 1, 128>}, {pipeline_mode = #tpu.pipeline_mode<synchronous>, transform_indices = @transform_3, window_bounds = array<i64: 128, 128>}, {pipeline_mode = #tpu.pipeline_mode<synchronous>, transform_indices = @transform_4, window_bounds = array<i64: 1, 128>}, {pipeline_mode = #tpu.pipeline_mode<synchronous>, transform_indices = @transform_5, window_bounds = array<i64: 128, 128>}, {pipeline_mode = #tpu.pipeline_mode<synchronous>, transform_indices = @transform_6, window_bounds = array<i64: 1, 128>}, {transform_indices = @transform_7, window_bounds = array<i64: 80, 128>}]} {
    %c0_i32 = arith.constant 0 : i32
    %0 = arith.cmpi eq, %arg1, %c0_i32 : i32
    %1 = arith.extui %0 : i1 to i32
    %c0_i32_0 = arith.constant 0 : i32
    %2 = arith.cmpi ne, %1, %c0_i32_0 : i32
    scf.if %2 {
      %c0_9 = arith.constant 0 : index
      %c0_10 = arith.constant 0 : index
      %12 = vector.load %arg4[%c0_9, %c0_10] : memref<1x128xf32, #tpu.memory_space<vmem>>, vector<1x128xf32>
      %13 = vector.shape_cast %12 : vector<1x128xf32> to vector<1x128xf32>
      %14 = vector.broadcast %13 : vector<1x128xf32> to vector<80x128xf32>
      %c0_11 = arith.constant 0 : index
      %c0_12 = arith.constant 0 : index
      %15 = vector.load %arg10[%c0_11, %c0_12] : memref<80x128xf32, #tpu.memory_space<vmem>>, vector<80x128xf32>
      tpu.vector_store %arg10[%c0_11, %c0_12], %14 {strides = array<i32>} : memref<80x128xf32, #tpu.memory_space<vmem>>, vector<80x128xf32>,
    } else {
    }
    %c0 = arith.constant 0 : index
    %c0_1 = arith.constant 0 : index
    %3 = vector.load %arg10[%c0, %c0_1] : memref<80x128xf32, #tpu.memory_space<vmem>>, vector<80x128xf32>
    %c0_2 = arith.constant 0 : index
    %c0_3 = arith.constant 0 : index
    %4 = vector.load %arg2[%c0_2, %c0_3] : memref<80x256xbf16, #tpu.memory_space<vmem>>, vector<80x256xbf16>
    %c0_4 = arith.constant 0 : index
    %c0_5 = arith.constant 0 : index
    %5 = vector.load %arg3[%c0_4, %c0_5] : memref<256x128xbf16, #tpu.memory_space<vmem>>, vector<256x128xbf16>
    %cst = arith.constant dense<0.000000e+00> : vector<80x128xf32>
    %6 = tpu.matmul %4, %5, %cst {dimension_numbers = #tpu.dot_dimension_numbers<[1], [0], [0], [1], [0, 0, 1, 1], [], []>} : vector<80x256xbf16>, vector<256x128xbf16>, vector<80x128xf32> -> vector<80x128xf32>
    %7 = arith.addf %3, %6 : vector<80x128xf32>
    %c0_6 = arith.constant 0 : index
    %c0_7 = arith.constant 0 : index
    %8 = vector.load %arg10[%c0_6, %c0_7] : memref<80x128xf32, #tpu.memory_space<vmem>>, vector<80x128xf32>
    tpu.vector_store %arg10[%c0_6, %c0_7], %7 {strides = array<i32>} : memref<80x128xf32, #tpu.memory_space<vmem>>, vector<80x128xf32>,
    %c3_i32 = arith.constant 3 : i32
    %9 = arith.cmpi eq, %arg1, %c3_i32 : i32
    %10 = arith.extui %9 : i1 to i32
    %c0_i32_8 = arith.constant 0 : i32
    %11 = arith.cmpi ne, %10, %c0_i32_8 : i32
    scf.if %11 {
      %c0_9 = arith.constant 0 : index
      %c0_10 = arith.constant 0 : index
      %12 = vector.load %arg10[%c0_9, %c0_10] : memref<80x128xf32, #tpu.memory_space<vmem>>, vector<80x128xf32>
      %cst_11 = arith.constant 0.000000e+00 : f32
      %13 = vector.broadcast %cst_11 : f32 to vector<80x128xf32>
      %14 = arith.maximumf %12, %13 : vector<80x128xf32>
      %15 = arith.truncf %14 : vector<80x128xf32> to vector<80x128xbf16>
      %c0_12 = arith.constant 0 : index
      %c0_13 = arith.constant 0 : index
      %16 = vector.load %arg5[%c0_12, %c0_13] : memref<128x128xbf16, #tpu.memory_space<vmem>>, vector<128x128xbf16>
      %cst_14 = arith.constant dense<0.000000e+00> : vector<80x128xf32>
      %17 = tpu.matmul %15, %16, %cst_14 {dimension_numbers = #tpu.dot_dimension_numbers<[1], [0], [0], [1], [0, 0, 1, 1], [], []>} : vector<80x128xbf16>, vector<128x128xbf16>, vector<80x128xf32> -> vector<80x128xf32>
      %c0_15 = arith.constant 0 : index
      %c0_16 = arith.constant 0 : index
      %18 = vector.load %arg6[%c0_15, %c0_16] : memref<1x128xf32, #tpu.memory_space<vmem>>, vector<1x128xf32>
      %19 = vector.broadcast %18 : vector<1x128xf32> to vector<80x128xf32>
      %20 = arith.addf %17, %19 : vector<80x128xf32>
      %cst_17 = arith.constant 0.000000e+00 : f32
      %21 = vector.broadcast %cst_17 : f32 to vector<80x128xf32>
      %22 = arith.maximumf %20, %21 : vector<80x128xf32>
      %23 = arith.truncf %22 : vector<80x128xf32> to vector<80x128xbf16>
      %c0_18 = arith.constant 0 : index
      %c0_19 = arith.constant 0 : index
      %24 = vector.load %arg7[%c0_18, %c0_19] : memref<128x128xbf16, #tpu.memory_space<vmem>>, vector<128x128xbf16>
      %cst_20 = arith.constant dense<0.000000e+00> : vector<80x128xf32>
      %25 = tpu.matmul %23, %24, %cst_20 {dimension_numbers = #tpu.dot_dimension_numbers<[1], [0], [0], [1], [0, 0, 1, 1], [], []>} : vector<80x128xbf16>, vector<128x128xbf16>, vector<80x128xf32> -> vector<80x128xf32>
      %c0_21 = arith.constant 0 : index
      %c0_22 = arith.constant 0 : index
      %26 = vector.load %arg8[%c0_21, %c0_22] : memref<1x128xf32, #tpu.memory_space<vmem>>, vector<1x128xf32>
      %27 = vector.broadcast %26 : vector<1x128xf32> to vector<80x128xf32>
      %28 = arith.addf %25, %27 : vector<80x128xf32>
      %c0_23 = arith.constant 0 : index
      %c0_24 = arith.constant 0 : index
      %29 = vector.load %arg9[%c0_23, %c0_24] : memref<80x128xf32, #tpu.memory_space<vmem>>, vector<80x128xf32>
      tpu.vector_store %arg9[%c0_23, %c0_24], %28 {strides = array<i32>} : memref<80x128xf32, #tpu.memory_space<vmem>>, vector<80x128xf32>,
    } else {
    }
    return
  }
  func.func @transform_0(%arg0: i32, %arg1: i32) -> (i32, i32) {
    %c0_i32 = arith.constant 0 : i32
    return %arg0, %arg1 : i32, i32
  }
  func.func @transform_1(%arg0: i32, %arg1: i32) -> (i32, i32) {
    %c0_i32 = arith.constant 0 : i32
    %c0_i32_0 = arith.constant 0 : i32
    return %arg1, %c0_i32 : i32, i32
  }
  func.func @transform_2(%arg0: i32, %arg1: i32) -> (i32, i32) {
    %c0_i32 = arith.constant 0 : i32
    %c0_i32_0 = arith.constant 0 : i32
    %c0_i32_1 = arith.constant 0 : i32
    return %c0_i32, %c0_i32_0 : i32, i32
  }
  func.func @transform_3(%arg0: i32, %arg1: i32) -> (i32, i32) {
    %c0_i32 = arith.constant 0 : i32
    %c0_i32_0 = arith.constant 0 : i32
    %c0_i32_1 = arith.constant 0 : i32
    return %c0_i32, %c0_i32_0 : i32, i32
  }
  func.func @transform_4(%arg0: i32, %arg1: i32) -> (i32, i32) {
    %c0_i32 = arith.constant 0 : i32
    %c0_i32_0 = arith.constant 0 : i32
    %c0_i32_1 = arith.constant 0 : i32
    return %c0_i32, %c0_i32_0 : i32, i32
  }
  func.func @transform_5(%arg0: i32, %arg1: i32) -> (i32, i32) {
    %c0_i32 = arith.constant 0 : i32
    %c0_i32_0 = arith.constant 0 : i32
    %c0_i32_1 = arith.constant 0 : i32
    return %c0_i32, %c0_i32_0 : i32, i32
  }
  func.func @transform_6(%arg0: i32, %arg1: i32) -> (i32, i32) {
    %c0_i32 = arith.constant 0 : i32
    %c0_i32_0 = arith.constant 0 : i32
    %c0_i32_1 = arith.constant 0 : i32
    return %c0_i32, %c0_i32_0 : i32, i32
  }
  func.func @transform_7(%arg0: i32, %arg1: i32) -> (i32, i32) {
    %c0_i32 = arith.constant 0 : i32
    %c0_i32_0 = arith.constant 0 : i32
    return %arg0, %c0_i32 : i32, i32
  }
}

</mosaic_0001>

<bundles_post_ra>
// kernel: tpu_custom_call.1
= control target key start
LH: loop header
LB: loop body
LE: loop exit
PB: predicated region body
PF: predicated region fallthrough
CT: control target
= control target key end

     0   :  { %s2460_s0 = inlined_call_operand.hbm [shape: bf16[160,1024], index: 0, kind: input, shape index: {}]   ;;  %s2461_s1 = inlined_call_operand.hbm [shape: bf16[1024,128], index: 1, kind: input, shape index: {}]   ;;  %s2462_s2 = inlined_call_operand.vmem [shape: f32[1,128], index: 2, kind: input, shape index: {}]   ;;  %s2463_s3 = inlined_call_operand.hbm [shape: bf16[128,128], index: 3, kind: input, shape index: {}]   ;;  %s2464_s4 = inlined_call_operand.vmem [shape: f32[1,128], index: 4, kind: input, shape index: {}]   ;;  %s2465_s5 = inlined_call_operand.hbm [shape: bf16[128,128], index: 5, kind: input, shape index: {}]   ;;  %s2466_s6 = inlined_call_operand.vmem [shape: f32[1,128], index: 6, kind: input, shape index: {}]   ;;  %s2467_s7 = inlined_call_operand.hbm [shape: f32[160,128], index: 7, kind: output, shape index: {}]  }
   0x1   :  { %2485 = sst [smem:[#allocation26_spill]] %s2460_s0 }
   0x2   :  { %2486 = sst [smem:[#allocation27_spill]] %s2462_s2 }
   0x3   :  { %2487 = sst [smem:[#allocation28_spill]] %s2463_s3 }
   0x4   :  { %2488 = sst [smem:[#allocation29_spill]] %s2464_s4 }
   0x5   :  { %2489 = sst [smem:[#allocation30_spill]] %s2465_s5 }
   0x6   :  { %2490 = sst [smem:[#allocation31_spill]] %s2466_s6 }
   0x7   :  { %2491 = sst [smem:[#allocation32_spill]] %s2467_s7 }
   0x8   :  { %12 = vsyncpa [#allocation4], 0 }
   0x9   :  { %14 = vsyncpa [#allocation4 + $0x1], 0 }
   0xa   :  { %15 = vsyncpa [#allocation7], 0 }
   0xb   :  { %17 = vsyncpa [#allocation7 + $0x1], 0 }
   0xc   :  { %18 = vsyncpa [#allocation10], 0 }
   0xd   :  { %19 = vsyncpa [#allocation5], 0 }
   0xe   :  { %21 = vsyncpa [#allocation5 + $0x1], 0  ;;  %s1955_s24 = smov 0   ;;  %s1957_s25 = smov 0  }
   0xf   :  { %s1959_s26 = smov 0   ;;  %s1961_s27 = smov 0  }
  0x10   :  { %s1963_s28 = smov 0   ;;  %s1965_s29 = smov 0  }
  0x11   :  { %s1967_s30 = smov 0   ;;  %s1969_s8 = smov 0  }
  0x12   :  { %s1971_s9 = smov 0   ;;  %s1973_s10 = smov 0  }
  0x13   :  { %s1975_s11 = smov 0   ;;  %s1977_s12 = smov 0  }
  0x14   :  { %s1979_s13 = smov 0   ;;  %s1981_s14 = smov 0  }
  0x15 LB: > { %2492 = sst [smem:[#allocation17_spill]] %s1847_s24  ;;  %s2022_s15 = sadd.s32 4294967295, %s1899_s14   ;;  %s1899_s14 = sphi %s1981_s14, %s27_s14   ;;  %s1895_s13 = sphi %s1979_s13, %s2541_s13   ;;  %s1891_s12 = sphi %s1977_s12, %s2554_s12   ;;  %s1887_s11 = sphi %s1975_s11, %s2553_s11   ;;  %s1883_s10 = sphi %s1973_s10, %s2552_s10   ;;  %s1879_s9 = sphi %s1971_s9, %s2551_s9   ;;  %s1875_s8 = sphi %s1969_s8, %s2550_s8   ;;  %s1871_s30 = sphi %s1967_s30, %s2549_s30   ;;  %s1867_s29 = sphi %s1965_s29, %s2548_s29   ;;  %s1863_s28 = sphi %s1963_s28, %s2547_s28   ;;  %s1859_s27 = sphi %s1961_s27, %s2546_s27   ;;  %s1855_s26 = sphi %s1959_s26, %s2545_s26   ;;  %s1851_s25 = sphi %s1957_s25, %s2544_s25   ;;  %s1847_s24 = sphi %s1955_s24, %s2543_s24  }
  0x16   : > { %2493 = sst [smem:[#allocation18_spill]] %s1883_s10  ;;  %s1186_s16 = sadd.s32 4294967294, %s1899_s14  }
  0x17   : > { %2494 = sst [smem:[#allocation19_spill]] %s1887_s11  ;;  %p61_p0 = scmp.ne.s32.totalorder %s1875_s8, %s1871_s30 }
  0x18   : > { %2495 = sst [smem:[#allocation20_spill]] %s1895_s13  ;;  %p2473_p1 = scmp.eq.s32.totalorder %s2022_s15, 0 }
  0x19   : > { %p87_p2 = scmp.ne.s32.totalorder %s1863_s28, %s1859_s27  ;;  %p215_p4 = scmp.ne.s32.totalorder %s1855_s26, %s1851_s25 }
  0x1a   : > { %p2031_p3 = por %p2473_p1, %p61_p0  ;;  %p216_p6 = scmp.eq.s32.totalorder %s2022_s15, 7 }
  0x1b   : > { %p2039_p5 = por %p87_p2, %p2473_p1  ;;  %p221_p7 = scmp.ne.s32.totalorder %s1851_s25, %s1847_s24 }
  0x1c   : > { %s2496_s18 = scalar_select %p2031_p3, 1, 0 }
  0x1d   : > { %s2497_s19 = scalar_select %p2039_p5, 1, 0 }
  0x1e   : > { %p222_p8 = scmp.eq.s32.totalorder %s1186_s16, 7  ;;  %p2046_p9 = por %p216_p6, %p215_p4 }
  0x1f   : > { %p1187_p10 = scmp.ge.s32.totalorder %s1899_s14, 1  ;;  %p229_p12 = scmp.lt.s32.totalorder %s1899_s14, 9 }
  0x20   : > { %s2498_s20 = scalar_select %p2046_p9, 1, 0 }
  0x21   : > { %p2051_p11 = por %p222_p8, %p221_p7  ;;  %p2056_p13 = pnand %p1187_p10, %p229_p12 }
  0x22   : > { %2499 = sst [smem:[#allocation21_spill]] %s2498_s20  ;;  %s1901_s23 = smov [#allocation8]  }
  0x23   : > { %s2500_s21 = scalar_select %p2051_p11, 1, 0 }
  0x24   : > { %s2502_s22 = scalar_select %p2056_p13, 1, 0 }
  0x25   : > { %2501 = sst [smem:[#allocation22_spill]] %s2500_s21  ;;  %s244_s27 = sshll.u32 %s1901_s23, 4  ;;  %s245_s27 = int_to_ptr.vmem [resolvable:$true] %s244_s27 }
  0x26   : > { %p1431_p0 = pneg %p2056_p13  ;;  %s1902_s16 = smov [#allocation9]  }
  0x27   : > { %s260_s17 = sshll.u32 %s1902_s16, 4  ;;  %s2504_s3 = sld [smem:[#allocation28_spill]]  ;;  %s2068_s17 = int_to_ptr.vmem [resolvable:$true] %s260_s17 }
  0x28   : > { %p2064_p2 = pnand %p1431_p0, %p2473_p1 }
  0x2a   : > { %p1627_p6 = pneg %p2064_p2 }
  0x2d   : > { %s1625_s7 = scalar_lea.hbm %s2504_s3, 1024 }
  0x2e   : > { %p1626_p4 = scmp.ne.s32.totalorder %s2504_s3, %s1625_s7  ;;  %p1632_p10 = scmp.lt.u32.totalorder %s1625_s7, %s2504_s3 }
  0x30   : > { %p1628_p7 = pnand %p1627_p6, %p1626_p4 }
  0x32   : > { %p1629_p8 = pneg %p1628_p7 }
  0x34   : > { %p1634_p12 = pnand %p1632_p10, %p1629_p8 }
  0x36   : > { %1637 = shalt.err (!%p1634_p12)
}
  0x37   : > { %s1638_s16 = scalar_lea.vmem %s245_s27, 1024  ;;  %p1646_p9 = scmp.lt.s32.totalorder %s245_s27, %s245_s27 }
  0x38   : > { %p1639_p0 = scmp.ne.s32.totalorder %s245_s27, %s1638_s16  ;;  %p1647_p5 = scmp.lt.s32.totalorder %s1638_s16, %s1638_s16 }
  0x3a   : > { %p1641_p1 = pnand %p1639_p0, %p1627_p6  ;;  %p1648_p3 = por %p1647_p5, %p1646_p9 }
  0x3c   : > { %p1642_p11 = pneg %p1641_p1 }
  0x3e   : > { %p1649_p13 = pnand %p1648_p3, %p1642_p11 }
  0x40   : > { %1652 = shalt.err (!%p1649_p13)
}
  0x41   : > { %s2478_s24 = smov 64   ;;  %s2479_s20 = smov 4  }
  0x42   : > { %1434 = dma.hbm_to_vmem [thread:$0]  (!%p2064_p2), %s2504_s3, 1024, %s245_s27, [#allocation7], %s2478_s24, %s2478_s24, %s2479_s20  }
  0x43   : > { %s2505_s5 = sld [smem:[#allocation30_spill]] }
  0x49   : > { %s1653_s23 = scalar_lea.hbm %s2505_s5, 1024 }
  0x4a   : > { %p1654_p1 = scmp.ne.s32.totalorder %s2505_s5, %s1653_s23  ;;  %p1660_p9 = scmp.lt.u32.totalorder %s1653_s23, %s2505_s5 }
  0x4c   : > { %p1656_p3 = pnand %p1654_p1, %p1627_p6 }
  0x4e   : > { %p1657_p5 = pneg %p1656_p3 }
  0x50   : > { %p1662_p11 = pnand %p1660_p9, %p1657_p5 }
  0x52   : > { %1665 = shalt.err (!%p1662_p11)
}
  0x53   : > { %s1666_s27 = scalar_lea.vmem %s2068_s17, 1024  ;;  %p1674_p8 = scmp.lt.s32.totalorder %s2068_s17, %s2068_s17 }
  0x54   : > { %p1667_p13 = scmp.ne.s32.totalorder %s2068_s17, %s1666_s27  ;;  %p1675_p10 = scmp.lt.s32.totalorder %s1666_s27, %s1666_s27 }
  0x56   : > { %p1669_p4 = pnand %p1667_p13, %p1627_p6  ;;  %p1676_p12 = por %p1675_p10, %p1674_p8 }
  0x58   : > { %p1670_p7 = pneg %p1669_p4 }
  0x5a   : > { %p1677_p0 = pnand %p1676_p12, %p1670_p7 }
  0x5c   : > { %1680 = shalt.err (!%p1677_p0)
}
  0x5d   : > { %1437 = dma.hbm_to_vmem [thread:$0]  (!%p2064_p2), %s2505_s5, 1024, %s2068_s17, [#allocation10], %s2478_s24, %s2478_s24, %s2479_s20  }
  0x5e   : > { %s36_s10 = sadd.s32 1, %s1891_s12  ;;  %s39_s30 = sadd.s32 1, %s1895_s13 }
  0x5f   : > { %p37_p6 = scmp.ge.s32.totalorder %s36_s10, 4  ;;  %s48_s6 = sadd.s32 1, %s1879_s9 }
  0x60   : > { %p55_p1 = scmp.ne.s32.totalorder %s1879_s9, %s1875_s8  ;;  %p2483_p3 = scmp.eq.s32.totalorder %s1899_s14, 0 }
  0x61   : > { %s2556_s10 = smov (%p37_p6, %s36_s10), 0  ;;  %s2558_s30 = smov (!%p37_p6, %s39_s30), %s1895_s13 }
  0x62   : > { %2506 = sst [smem:[#allocation23_spill]] %s2556_s10  ;;  %s2134_s7 = ssub.s32 %s1891_s12, %s2556_s10 }
  0x63   : > { %p2138_p2 = por %p2483_p3, %p55_p1  ;;  %p41_p5 = scmp.ge.s32.totalorder %s2558_s30, 2 }
  0x64   : > { %p72_p9 = scmp.eq.s32.totalorder %s2134_s7, 0  ;;  %p2482_p11 = scmp.lt.s32.totalorder %s1899_s14, 8 }
  0x65   : > { %s277_s11 = sand.u32 1, %s1879_s9   ;;  %s2560_s30 = smov (%p41_p5, %s2558_s30), 0 }
  0x66   : > { %2508 = sst [smem:[#allocation24_spill]] %s2560_s30  ;;  %s1414_s21 = smul.u32 80, %s277_s11 }
  0x67   : > { %s43_s23 = ssub.s32 %s1895_s13, %s2560_s30  ;;  %s1191_s16 = sshll.u32 %s1891_s12, 1 }
  0x68   : > { %s45_s27 = sor.u32 %s2134_s7, %s43_s23  ;;  %p203_p13 = scmp.eq.s32.totalorder %s43_s23, 0 }
  0x69   : > { %p46_p4 = scmp.eq.s32.totalorder %s45_s27, 0  ;;  %s2509_s2 = sadd.s32 1, %s1855_s26 }
  0x6a   : > { %s2154_s4 = scalar_select %p203_p13, %s1855_s26, %s2509_s2  }
  0x6b   : > { %s2157_s24 = scalar_select %p46_p4, %s1879_s9, %s48_s6  }
  0x6c   : > { %s1251_s20 = smul.u32 80, %s1895_s13  ;;  %s281_s3 = scalar_lea.vmem [#allocation3], %s1414_s21 }
  0x6d   : > { %2510 = sst [smem:[#allocation25_spill]] %s2157_s24  ;;  %s291_s5 = sshll.u32 %s281_s3, 4  ;;  %s2160_s5 = int_to_ptr.vmem [resolvable:$true] %s291_s5 }
  0x6e   : > { %p2166_p7 = pnand %p2482_p11, %p2138_p2  ;;  %s288_s23 = sadd.s32 %s1251_s20, %s1191_s16 }
  0x6f   : > { %s1193_s27 = sshll.u32 %s288_s23, 6  ;;  %s2512_s0 = sld [smem:[#allocation26_spill]] }
  0x70   : > { %s2175_s3 = scalar_lea.sflag [#allocation4], %s277_s11  ;;  %p1683_p10 = pneg %p2166_p7 }
  0x75   : > { %s2173_s6 = scalar_lea.hbm %s2512_s0, %s1193_s27  ;;  %s1686_s30 = scalar_lea.hbm %s2512_s0, 10240 }
  0x76   : > { %s1681_s17 = scalar_lea.hbm %s2173_s6, 1280  ;;  %p1687_p6 = scmp.lt.u32.totalorder %s2173_s6, %s2512_s0 }
  0x77   : > { %p1682_p8 = scmp.ne.s32.totalorder %s2173_s6, %s1681_s17  ;;  %p1688_p1 = scmp.lt.u32.totalorder %s1686_s30, %s1681_s17 }
  0x78   : > { %p1690_p5 = scmp.lt.u32.totalorder %s1681_s17, %s2173_s6 }
  0x79   : > { %p1684_p12 = pnand %p1683_p10, %p1682_p8  ;;  %p1689_p2 = por %p1688_p1, %p1687_p6 }
  0x7b   : > { %p1685_p0 = pneg %p1684_p12  ;;  %p1691_p13 = por %p1690_p5, %p1689_p2 }
  0x7d   : > { %p1692_p4 = pnand %p1691_p13, %p1685_p0 }
  0x7f   : > { %1695 = shalt.err (!%p1692_p4)
}
  0x80   : > { %s1696_s11 = scalar_lea.vmem %s2160_s5, 1280  ;;  %s1905_s27 = smov [#allocation3]  }
  0x81   : > { %p1697_p8 = scmp.ne.s32.totalorder %s2160_s5, %s1696_s11  ;;  %s1701_s2 = sshll.u32 %s1905_s27, 4  ;;  %s1702_s2 = int_to_ptr.vmem [resolvable:$false] %s1701_s2 }
  0x82   : > { %s1703_s20 = scalar_lea.vmem %s1702_s2, 2560  ;;  %p1704_p3 = scmp.lt.s32.totalorder %s2160_s5, %s1702_s2 }
  0x83   : > { %p1699_p12 = pnand %p1697_p8, %p1683_p10  ;;  %p1705_p6 = scmp.lt.s32.totalorder %s1703_s20, %s1696_s11 }
  0x85   : > { %p1700_p11 = pneg %p1699_p12  ;;  %p1706_p1 = por %p1705_p6, %p1704_p3 }
  0x87   : > { %p1707_p2 = pnand %p1706_p1, %p1700_p11 }
  0x89   : > { %1710 = shalt.err (!%p1707_p2)
}
  0x8a   : > { %s1906_s17 = smov 512   ;;  %s1907_s21 = smov 128  }
  0x8b   : > { %s1908_s30 = smov 8   ;;  %s301_s16 = sand.u32 1, %s1899_s14  }
  0x8c   : > { %1441 = dma.hbm_to_vmem [thread:$0]  (!%p2166_p7), %s2173_s6, 1280, %s2160_s5, %s2175_s3, %s1906_s17, %s1907_s21, %s1908_s30  }
  0x8d   : > { %s74_s23 = sadd.s32 1, %s1867_s29  ;;  %p81_p3 = scmp.ne.s32.totalorder %s1867_s29, %s1863_s28 }
  0x8e   : > { %s2210_s11 = scalar_select %p72_p9, %s1867_s29, %s74_s23  }
  0x8f   : > { %p2513_p11 = scmp.eq.s32.totalorder %s1899_s14, 0  ;;  %s303_s27 = sand.u32 1, %s1867_s29  }
  0x90   : > { %s1252_s2 = sshll.u32 %s1891_s12, 11  ;;  %s1194_s20 = sshll.u32 %s303_s27, 7 }
  0x91   : > { %p83_p10 = por %p81_p3, %p2513_p11  ;;  %s2219_s24 = scalar_lea.hbm %s2461_s1, %s1252_s2 }
  0x92   : > { %p2514_p0 = scmp.lt.s32.totalorder %s1899_s14, 8  ;;  %s305_s10 = scalar_lea.vmem [#allocation6], %s1194_s20 }
  0x93   : > { %s312_s7 = sshll.u32 %s305_s10, 4  ;;  %s2229_s6 = scalar_lea.sflag [#allocation7], %s301_s16  ;;  %s2227_s7 = int_to_ptr.vmem [resolvable:$true] %s312_s7 }
  0x94   : > { %p2223_p7 = pnand %p2514_p0, %p83_p10  ;;  %s1711_s0 = scalar_lea.hbm %s2219_s24, 2048 }
  0x95   : > { %p1712_p9 = scmp.ne.s32.totalorder %s2219_s24, %s1711_s0  ;;  %s1716_s17 = scalar_lea.hbm %s2461_s1, 8192 }
  0x96   : > { %p1713_p5 = pneg %p2223_p7  ;;  %p1717_p8 = scmp.lt.u32.totalorder %s2219_s24, %s2461_s1 }
  0x97   : > { %p1718_p12 = scmp.lt.u32.totalorder %s1716_s17, %s1711_s0  ;;  %p1720_p1 = scmp.lt.u32.totalorder %s1711_s0, %s2219_s24 }
  0x98   : > { %p1714_p13 = pnand %p1713_p5, %p1712_p9 }
  0x99   : > { %p1719_p6 = por %p1718_p12, %p1717_p8 }
  0x9a   : > { %p1715_p4 = pneg %p1714_p13 }
  0x9b   : > { %p1721_p2 = por %p1720_p1, %p1719_p6 }
  0x9d   : > { %p1722_p3 = pnand %p1721_p2, %p1715_p4 }
  0x9f   : > { %1725 = shalt.err (!%p1722_p3)
}
  0xa0   : > { %s1726_s16 = scalar_lea.vmem %s2227_s7, 2048  ;;  %s1909_s23 = smov [#allocation6]  }
  0xa1   : > { %p1727_p11 = scmp.ne.s32.totalorder %s2227_s7, %s1726_s16  ;;  %s1731_s27 = sshll.u32 %s1909_s23, 4  ;;  %s1732_s27 = int_to_ptr.vmem [resolvable:$false] %s1731_s27 }
  0xa2   : > { %s1733_s2 = scalar_lea.vmem %s1732_s27, 4096  ;;  %p1734_p9 = scmp.lt.s32.totalorder %s2227_s7, %s1732_s27 }
  0xa3   : > { %p1729_p10 = pnand %p1727_p11, %p1713_p5  ;;  %p1735_p13 = scmp.lt.s32.totalorder %s1733_s2, %s1726_s16 }
  0xa5   : > { %p1730_p0 = pneg %p1729_p10  ;;  %p1736_p8 = por %p1735_p13, %p1734_p9 }
  0xa7   : > { %p1737_p12 = pnand %p1736_p8, %p1730_p0 }
  0xa9   : > { %1740 = shalt.err (!%p1737_p12)
}
  0xaa   : > { %s2516_s20 = smov 4   ;;  %s2517_s10 = smov 64  }
  0xab   : > { %1444 = dma.hbm_to_vmem [thread:$0]  (!%p2223_p7), %s2219_s24, 2048, %s2227_s7, %s2229_s6, %s2517_s10, %s2517_s10, %s2516_s20  }
  0xac   : > { %p2518_p5 = scmp.ne.s32.totalorder %s2502_s22, 0 }
  0xad   : > { %s326_s0 = sand.u32 (!%p2518_p5), 1, %s1875_s8   ;;  %p2519_p4 = scmp.ne.s32.totalorder (!%p2518_p5), %s2496_s18, 0 }
  0xae   : > { %324 = sbr.rel (%p2518_p5) target bundleno = 974 (0x3ce), region = 48  ;;  %s327_s3 = scalar_lea.sflag (!%p2518_p5), [#allocation4], %s326_s0 }
  0xaf   : > { %s1415_s13 = smul.u32 (!%p2518_p5), 80, %s326_s0 }
  0xb1   : > { %s2263_s17 = scalar_lea.vmem (!%p2518_p5), [#allocation3], %s1415_s13 }
  0xb5   : > { %1826 = dma.done.wait (%p2519_p4), %s327_s3, 1280  }
  0xb6   : > { %1828 = vsyncadd (%p2519_p4), %s327_s3, 4294966016  ;;  %s335_s5 = sand.u32 1, %s2022_s15   ;;  %s337_s24 = sand.u32 1, %s1863_s28  }
  0xb7   : > { %s1198_s7 = sshll.u32 %s337_s24, 7  ;;  %s336_s22 = scalar_lea.sflag [#allocation7], %s335_s5 }
  0xb8   : > { %s2271_s6 = scalar_lea.vmem [#allocation6], %s1198_s7  ;;  %p2520_p7 = scmp.ne.s32.totalorder %s2497_s19, 0 }
  0xba   : > { %1830 = dma.done.wait (%p2520_p7), %s336_s22, 2048  }
  0xbb   : > { %1832 = vsyncadd (%p2520_p7), %s336_s22, 4294965248  ;;  %p2521_p6 = scmp.eq.s32.totalorder %s2022_s15, 0 }
  0xbd   : > { %1834 = dma.done.wait (%p2521_p6), [#allocation7], 1024   ;;  %p2522_p1 = pmov %p2521_p6 }
  0xbf   : > { %1836 = vsyncadd (%p2522_p1), [#allocation7], 4294966272  ;;  %p2523_p2 = pmov %p2522_p1 }
  0xc0   : > { %p2524_p3 = pmov %p2522_p1 }
  0xc1   : > { %1838 = dma.done.wait (%p2523_p2), [#allocation10], 1024  }
  0xc2   : > { %1840 = vsyncadd (%p2524_p3), [#allocation10], 4294966272  ;;  %s380_s18 = sand.u32 1, %s1851_s25   ;;  %s2525_s19 = sld [smem:[#allocation18_spill]] }
  0xc3   : > { %s1416_s21 = smul.u32 80, %s380_s18 }
  0xc5   : > { %s2288_s30 = scalar_lea.vmem [#allocation11], %s1416_s21 }
  0xc8   : > { %p1201_p11 = scmp.ne.s32.totalorder %s2525_s19, 0 }
  0xc9   : > { %s2526_s27 = sld [smem:[#allocation27_spill]] (!%p1201_p11) }
  0xca   : > { %391 = sbr.rel (%p1201_p11) target bundleno = 213 (0xd5), region = 68 }
  0xcf   : > { %v1202_v0 = vld [vmem:[%s2526_s27] ss:$0 sm:$0xff] (!%p1201_p11) }
  0xd0   : > { %399 = vst [vmem:[#allocation2] sm:$0xff] (!%p1201_p11), %v1202_v0  ;;  %400 = vst [vmem:[#allocation2 + $0x8] sm:$0xff] (!%p1201_p11), %v1202_v0 }
  0xd1   : > { %401 = vst [vmem:[#allocation2 + $0x10] sm:$0xff] %v1202_v0  ;;  %402 = vst [vmem:[#allocation2 + $0x18] sm:$0xff] %v1202_v0 }
  0xd2   : > { %403 = vst [vmem:[#allocation2 + $0x20] sm:$0xff] %v1202_v0  ;;  %404 = vst [vmem:[#allocation2 + $0x28] sm:$0xff] %v1202_v0 }
  0xd3   : > { %405 = vst [vmem:[#allocation2 + $0x30] sm:$0xff] %v1202_v0  ;;  %406 = vst [vmem:[#allocation2 + $0x38] sm:$0xff] %v1202_v0 }
  0xd4   : > { %407 = vst [vmem:[#allocation2 + $0x40] sm:$0xff] %v1202_v0  ;;  %408 = vst [vmem:[#allocation2 + $0x48] sm:$0xff] %v1202_v0 }
  0xd5 PF: > { %v1578_v1 = vld [vmem:[%s2271_s6 + $0x40] sm:$0xff]   ;;  %v1580_v3 = vld [vmem:[%s2271_s6 + $0x48] sm:$0xff]   ;;  %v1582_v5 = vld [vmem:[%s2271_s6 + $0x50] sm:$0xff]   ;;  %s2527_s15 = sld [smem:[#allocation18_spill]] }
  0xd6   : > { %v1579_v2 = vld [vmem:[%s2271_s6] sm:$0xff]   ;;  %1254 = vmatprep.subr.bf16.mxu0 %v1578_v1  ;;  %1398 = vmatprep.subr.bf16.mxu1 %v1578_v1  ;;  %v1581_v4 = vld [vmem:[%s2271_s6 + $0x8] sm:$0xff]   ;;  %v1583_v6 = vld [vmem:[%s2271_s6 + $0x10] sm:$0xff]  }
  0xd7   : > { %1255 = vmatpush3.bf16.msra.mxu0 %v1579_v2  ;;  %1406 = vmatpush3.bf16.msra.mxu1 %v1579_v2  ;;  %v1584_v7 = vld [vmem:[%s2271_s6 + $0x58] sm:$0xff]   ;;  %v1586_v9 = vld [vmem:[%s2271_s6 + $0x60] sm:$0xff]   ;;  %v1588_v11 = vld [vmem:[%s2271_s6 + $0x68] sm:$0xff]  }
  0xd8   : > { %1256 = vmatprep.subr.bf16.mxu0 %v1580_v3  ;;  %1399 = vmatprep.subr.bf16.mxu1 %v1580_v3  ;;  %v1585_v8 = vld [vmem:[%s2271_s6 + $0x18] sm:$0xff]   ;;  %v1587_v10 = vld [vmem:[%s2271_s6 + $0x20] sm:$0xff]   ;;  %v1589_v14 = vld [vmem:[%s2271_s6 + $0x28] sm:$0xff]  }
  0xd9   : > { %v1596_v12 = vld [vmem:[%s2263_s17 + $0x4] ss:$8 sps:$4 sm:$0xff]   ;;  %v1599_v13 = vld [vmem:[%s2263_s17 + $0x34] ss:$8 sps:$4 sm:$0xff]   ;;  %v1594_v19 = vld [vmem:[%s2263_s17] ss:$8 sps:$4 sm:$0xff]  }
  0xda   : > { %v1590_v15 = vld [vmem:[%s2271_s6 + $0x70] sm:$0xff]   ;;  %639 = vmatprep.mubr.bf16.mxu0 %v1596_v12  ;;  %663 = vmatprep.mubr.bf16.mxu1 %v1599_v13  ;;  %v1592_v17 = vld [vmem:[%s2271_s6 + $0x78] sm:$0xff]   ;;  %v415_v31 = vld [vmem:[#allocation2 + $0x30] sm:$0xff] }
  0xdb   : > { %1257 = vmatpush3.bf16.msra.mxu0 %v1581_v4  ;;  %1407 = vmatpush3.bf16.msra.mxu1 %v1581_v4  ;;  %v1591_v16 = vld [vmem:[%s2271_s6 + $0x30] sm:$0xff]   ;;  %v1593_v18 = vld [vmem:[%s2271_s6 + $0x38] sm:$0xff]   ;;  %v416_v39 = vld [vmem:[#allocation2 + $0x38] sm:$0xff]  ;;  %p1229_p10 = scmp.ne.s32.totalorder %s2527_s15, 3 }
  0xdc   : > { %1258 = vmatprep.subr.bf16.mxu0 %v1582_v5  ;;  %1400 = vmatprep.subr.bf16.mxu1 %v1582_v5  ;;  %v1597_v20 = vld [vmem:[%s2263_s17 + $0x30] ss:$8 sps:$4 sm:$0xff]   ;;  %v1600_v21 = vld [vmem:[%s2263_s17 + $0x14] ss:$8 sps:$4 sm:$0xff]   ;;  %v1603_v22 = vld [vmem:[%s2263_s17 + $0x44] ss:$8 sps:$4 sm:$0xff]  }
  0xdd   : > { %v1602_v23 = vld [vmem:[%s2263_s17 + $0x10] ss:$8 sps:$4 sm:$0xff]   ;;  %v1605_v24 = vld [vmem:[%s2263_s17 + $0x40] ss:$8 sps:$4 sm:$0xff]   ;;  %v1606_v25 = vld [vmem:[%s2263_s17 + $0x24] ss:$8 sps:$4 sm:$0xff]  }
  0xde   : > { %v1608_v26 = vld [vmem:[%s2263_s17 + $0x20] ss:$8 sps:$4 sm:$0xff]   ;;  %vm1911_vm0 = vmmov (!%p1229_p10), 0   ;;  %s2528_s10 = sld [smem:[#allocation29_spill]] (!%p1229_p10)  ;;  %s2529_s3 = sld [smem:[#allocation31_spill]] (!%p1229_p10) }
  0xdf   : > { %1259 = vmatpush3.bf16.msra.mxu0 %v1583_v6  ;;  %1408 = vmatpush3.bf16.msra.mxu1 %v1583_v6  ;;  %v409_v29 = vld [vmem:[#allocation2] sm:$0xff]  ;;  %v410_v37 = vld [vmem:[#allocation2 + $0x8] sm:$0xff]  ;;  %v411_v49 = vld [vmem:[#allocation2 + $0x10] sm:$0xff] }
  0xe0   : > { %1260 = vmatprep.subr.bf16.mxu0 %v1584_v7  ;;  %1401 = vmatprep.subr.bf16.mxu1 %v1584_v7  ;;  %v417_v51 = vld [vmem:[#allocation2 + $0x40] sm:$0xff]  ;;  %v412_v57 = vld [vmem:[#allocation2 + $0x18] sm:$0xff]  ;;  %v418_v59 = vld [vmem:[#allocation2 + $0x48] sm:$0xff] }
  0xe1   : > { %v413_v4 = vld [vmem:[#allocation2 + $0x20] sm:$0xff]  ;;  %v1609_v13 = vld [vmem:[#allocation8] sm:$0xff] (!%p1229_p10)  }
  0xe3   : > { %1261 = vmatpush3.bf16.msra.mxu0 %v1585_v8  ;;  %1409 = vmatpush3.bf16.msra.mxu1 %v1585_v8  ;;  %v414_v8 = vld [vmem:[#allocation2 + $0x28] sm:$0xff] }
  0xe4   : > { %1262 = vmatprep.subr.bf16.mxu0 %v1586_v9  ;;  %1402 = vmatprep.subr.bf16.mxu1 %v1586_v9 }
  0xe7   : > { %1263 = vmatpush3.bf16.msra.mxu0 %v1587_v10  ;;  %1410 = vmatpush3.bf16.msra.mxu1 %v1587_v10 }
  0xe8   : > { %1264 = vmatprep.subr.bf16.mxu0 %v1588_v11  ;;  %1403 = vmatprep.subr.bf16.mxu1 %v1588_v11 }
  0xeb   : > { %1265 = vmatpush3.bf16.msra.mxu0 %v1589_v14  ;;  %1411 = vmatpush3.bf16.msra.mxu1 %v1589_v14  ;;  %v1910_v14 = vmov (!%p1229_p10), 0.0  }
  0xec   : > { %1266 = vmatprep.subr.bf16.mxu0 %v1590_v15  ;;  %1404 = vmatprep.subr.bf16.mxu1 %v1590_v15  ;;  %v1610_v15 = vld [vmem:[#allocation8 + $0x8] sm:$0xff] (!%p1229_p10)  }
  0xef   : > { %1267 = vmatpush3.bf16.msra.mxu0 %v1591_v16  ;;  %1412 = vmatpush3.bf16.msra.mxu1 %v1591_v16  ;;  %v1611_v16 = vld [vmem:[#allocation8 + $0x10] sm:$0xff] (!%p1229_p10)  }
  0xf0   : > { %1268 = vmatprep.subr.bf16.mxu0 %v1592_v17  ;;  %1405 = vmatprep.subr.bf16.mxu1 %v1592_v17  ;;  %v1612_v17 = vld [vmem:[#allocation8 + $0x18] sm:$0xff] (!%p1229_p10)  }
  0xf3   : > { %1269 = vmatpush3.bf16.msra.mxu0 %v1593_v18  ;;  %1413 = vmatpush3.bf16.msra.mxu1 %v1593_v18  ;;  %v1617_v18 = vld [vmem:[#allocation9] sm:$0xff] (!%p1229_p10)  }
  0xf4   : > { %1326 = vmatprep.subr.bf16.mxu0 (!%p1229_p10), %v1910_v14  ;;  %1362 = vmatprep.subr.bf16.mxu1 (!%p1229_p10), %v1910_v14 }
  0xf6   : > { %640 = vmatmul.mubr.bf16.vlgmr.msra.gmra.mrb[0].mxu0 %v1594_v19  ;;  %664 = vmatmul.mubr.bf16.vlgmr.msra.gmra.mrb[0].mxu1 %v1597_v20  ;;  %v1613_v19 = vld [vmem:[#allocation8 + $0x20] sm:$0xff] (!%p1229_p10)   ;;  %v1618_v20 = vld [vmem:[#allocation9 + $0x8] sm:$0xff] (!%p1229_p10)  }
  0xf7   : > { %647 = vmatprep.mubr.bf16.mxu0 %v1600_v21  ;;  %671 = vmatprep.mubr.bf16.mxu1 %v1603_v22  ;;  %v1614_v21 = vld [vmem:[#allocation8 + $0x28] sm:$0xff] (!%p1229_p10)   ;;  %v1619_v22 = vld [vmem:[#allocation9 + $0x10] sm:$0xff] (!%p1229_p10)  }
  0xf8   : > { %1327 = vmatpush3.bf16.msra.mxu0 (!%p1229_p10), %v1609_v13  ;;  %1363 = vmatpush3.bf16.msra.mxu1 (!%p1229_p10), %v1617_v18 }
  0xf9   : > { %1328 = vmatprep.subr.bf16.mxu0 (!%p1229_p10), %v1910_v14  ;;  %1364 = vmatprep.subr.bf16.mxu1 (!%p1229_p10), %v1910_v14 }
  0xfc   : > { %1329 = vmatpush3.bf16.msra.mxu0 (!%p1229_p10), %v1610_v15  ;;  %1365 = vmatpush3.bf16.msra.mxu1 (!%p1229_p10), %v1618_v20 }
  0xfd   : > { %1330 = vmatprep.subr.bf16.mxu0 (!%p1229_p10), %v1910_v14  ;;  %1366 = vmatprep.subr.bf16.mxu1 (!%p1229_p10), %v1910_v14 }
  0xfe   : > { %648 = vmatmul.mubr.bf16.gmra.mrb[4].mxu0 %v1602_v23  ;;  %672 = vmatmul.mubr.bf16.gmra.mrb[4].mxu1 %v1605_v24  ;;  %v1615_v23 = vld [vmem:[#allocation8 + $0x30] sm:$0xff] (!%p1229_p10)  }
  0xff   : > { %655 = vmatprep.mubr.bf16.mxu0 %v1606_v25  ;;  %1378 = vmatprep.mubr.msk.bf16.mxu1 (!%p1229_p10), %vm1911_vm0, %v1910_v14 }
 0x100   : > { %1331 = vmatpush3.bf16.msra.mxu0 (!%p1229_p10), %v1611_v16  ;;  %1367 = vmatpush3.bf16.msra.mxu1 (!%p1229_p10), %v1619_v22 }
 0x101   : > { %1332 = vmatprep.subr.bf16.mxu0 (!%p1229_p10), %v1910_v14  ;;  %1368 = vmatprep.subr.bf16.mxu1 (!%p1229_p10), %v1910_v14 }
 0x104   : > { %1333 = vmatpush3.bf16.msra.mxu0 (!%p1229_p10), %v1612_v17 }
 0x105   : > { %1334 = vmatprep.subr.bf16.mxu0 (!%p1229_p10), %v1910_v14 }
 0x106   : > { %656 = vmatmul.mubr.bf16.gmra.mrb[8].mxu0 %v1608_v26  ;;  %v1620_v26 = vld [vmem:[#allocation9 + $0x18] sm:$0xff] (!%p1229_p10)  }
 0x107   : > { %1342 = vmatprep.mubr.msk.bf16.mxu0 (!%p1229_p10), %vm1911_vm0, %v1910_v14  ;;  %1369 = vmatpush3.bf16.msra.mxu1 (!%p1229_p10), %v1620_v26 }
 0x108   : > { %1335 = vmatpush3.bf16.msra.mxu0 (!%p1229_p10), %v1613_v19  ;;  %1370 = vmatprep.subr.bf16.mxu1 (!%p1229_p10), %v1910_v14 }
 0x109   : > { %1336 = vmatprep.subr.bf16.mxu0 (!%p1229_p10), %v1910_v14 }
 0x10c   : > { %1337 = vmatpush3.bf16.msra.mxu0 (!%p1229_p10), %v1614_v21 }
 0x10d   : > { %1338 = vmatprep.subr.bf16.mxu0 (!%p1229_p10), %v1910_v14 }
 0x110   : > { %1339 = vmatpush3.bf16.msra.mxu0 (!%p1229_p10), %v1615_v23 }
 0x111   : > { %1340 = vmatprep.subr.bf16.mxu0 (!%p1229_p10), %v1910_v14 }
 0x1c9   : > { %v1270_v27 = vpop.f32.mrb[0].mxu0  ;;  %v1288_v28 = vpop.f32.mrb[0].mxu1 }
 0x1ca   : > { %v1271_v30 = vpop.f32.mrb[1].mxu0  ;;  %v1289_v32 = vpop.f32.mrb[1].mxu1 }
 0x1cb   : > { %v1272_v33 = vadd.f32 %v1271_v30, %v1270_v27  ;;  %v1273_v34 = vpop.f32.mrb[2].mxu0  ;;  %v1290_v35 = vadd.f32 %v1289_v32, %v1288_v28  ;;  %v1291_v36 = vpop.f32.mrb[2].mxu1  ;;  %v1621_v30 = vld [vmem:[#allocation9 + $0x20] sm:$0xff] (!%p1229_p10)  }
 0x1cc   : > { %v1274_v38 = vpop.f32.mrb[3].mxu0  ;;  %v1292_v40 = vpop.f32.mrb[3].mxu1  ;;  %1371 = vmatpush3.bf16.msra.mxu1 (!%p1229_p10), %v1621_v30 }
 0x1cd   : > { %v680_v41 = vadd.f32 %v1272_v33, %v409_v29  ;;  %v1275_v42 = vadd.f32 %v1274_v38, %v1273_v34  ;;  %v686_v43 = vadd.f32 %v1290_v35, %v415_v31  ;;  %v1293_v44 = vadd.f32 %v1292_v40, %v1291_v36  ;;  %v1616_v29 = vld [vmem:[#allocation8 + $0x38] sm:$0xff] (!%p1229_p10)   ;;  %v1622_v34 = vld [vmem:[#allocation9 + $0x28] sm:$0xff] (!%p1229_p10)   ;;  %1372 = vmatprep.subr.bf16.mxu1 (!%p1229_p10), %v1910_v14 }
 0x1ce   : > { %1341 = vmatpush3.bf16.msra.mxu0 (!%p1229_p10), %v1616_v29 }
 0x1cf   : > { %690 = vst [vmem:[#allocation2] sm:$0xff] %v680_v41  ;;  %v681_v45 = vadd.f32 %v1275_v42, %v410_v37  ;;  %696 = vst [vmem:[#allocation2 + $0x30] sm:$0xff] %v686_v43  ;;  %v687_v46 = vadd.f32 %v1293_v44, %v416_v39 }
 0x1d0   : > { %1373 = vmatpush3.bf16.msra.mxu1 (!%p1229_p10), %v1622_v34 }
 0x1d1   : > { %691 = vst [vmem:[#allocation2 + $0x8] sm:$0xff] %v681_v45  ;;  %v1276_v47 = vpop.f32.mrb[4].mxu0  ;;  %697 = vst [vmem:[#allocation2 + $0x38] sm:$0xff] %v687_v46  ;;  %v1294_v48 = vpop.f32.mrb[4].mxu1  ;;  %1374 = vmatprep.subr.bf16.mxu1 (!%p1229_p10), %v1910_v14 }
 0x1d2   : > { %v1277_v50 = vpop.f32.mrb[5].mxu0  ;;  %v1295_v52 = vpop.f32.mrb[5].mxu1 }
 0x1d3   : > { %v1278_v53 = vadd.f32 %v1277_v50, %v1276_v47  ;;  %v1279_v54 = vpop.f32.mrb[6].mxu0  ;;  %v1296_v55 = vadd.f32 %v1295_v52, %v1294_v48  ;;  %v1297_v56 = vpop.f32.mrb[6].mxu1 }
 0x1d4   : > { %v1280_v58 = vpop.f32.mrb[7].mxu0  ;;  %v1298_v60 = vpop.f32.mrb[7].mxu1 }
 0x1d5   : > { %v682_v61 = vadd.f32 %v1278_v53, %v411_v49  ;;  %v1281_v62 = vadd.f32 %v1280_v58, %v1279_v54  ;;  %v688_v63 = vadd.f32 %v1296_v55, %v417_v51  ;;  %v1299_v0 = vadd.f32 %v1298_v60, %v1297_v56  ;;  %v1623_v53 = vld [vmem:[#allocation9 + $0x30] sm:$0xff] (!%p1229_p10)   ;;  %v1624_v54 = vld [vmem:[#allocation9 + $0x38] sm:$0xff] (!%p1229_p10)  }
 0x1d6   : > { %v704_v24 = vld [vmem:[#allocation2] sm:$0xff] (!%p1229_p10)  ;;  %v710_v43 = vld [vmem:[#allocation2 + $0x30] sm:$0xff] (!%p1229_p10)  ;;  %1375 = vmatpush3.bf16.msra.mxu1 (!%p1229_p10), %v1623_v53 }
 0x1d7   : > { %692 = vst [vmem:[#allocation2 + $0x10] sm:$0xff] %v682_v61  ;;  %v683_v1 = vadd.f32 %v1281_v62, %v412_v57  ;;  %698 = vst [vmem:[#allocation2 + $0x40] sm:$0xff] %v688_v63  ;;  %v689_v2 = vadd.f32 %v1299_v0, %v418_v59  ;;  %v714_v27 = vmax.f32 (!%p1229_p10), %v704_v24, 0.0  ;;  %v720_v45 = vmax.f32 (!%p1229_p10), %v710_v43, 0.0  ;;  %1376 = vmatprep.subr.bf16.mxu1 (!%p1229_p10), %v1910_v14  ;;  %v1230_v55 = vld [vmem:[%s2528_s10] ss:$0 sm:$0xff] (!%p1229_p10) }
 0x1d8   : > { %v705_v25 = vld [vmem:[#allocation2 + $0x8] sm:$0xff] (!%p1229_p10)  ;;  %v711_v44 = vld [vmem:[#allocation2 + $0x38] sm:$0xff] (!%p1229_p10) }
 0x1d9   : > { %693 = vst [vmem:[#allocation2 + $0x18] sm:$0xff] %v683_v1  ;;  %v1282_v3 = vpop.f32.mrb[8].mxu0  ;;  %699 = vst [vmem:[#allocation2 + $0x48] sm:$0xff] %v689_v2  ;;  %v715_v28 = vmax.f32 (!%p1229_p10), %v705_v25, 0.0  ;;  %v721_v46 = vmax.f32 (!%p1229_p10), %v711_v44, 0.0 }
 0x1da   : > { %v1283_v5 = vpop.f32.mrb[9].mxu0  ;;  %1377 = vmatpush3.bf16.msra.mxu1 (!%p1229_p10), %v1624_v54 }
 0x1db   : > { %v1284_v6 = vadd.f32 %v1283_v5, %v1282_v3  ;;  %v1285_v7 = vpop.f32.mrb[10].mxu0  ;;  %703 = sbr.rel (%p1229_p10) target bundleno = 946 (0x3b2), region = 72  ;;  %v724_v31 = vpack.c.bf16 (!%p1229_p10), %v715_v28, %v714_v27  ;;  %v727_v47 = vpack.c.bf16 (!%p1229_p10), %v721_v46, %v720_v45 }
 0x1dc   : > { %v1286_v9 = vpop.f32.mrb[11].mxu0 }
 0x1dd   : > { %v684_v10 = vadd.f32 %v1284_v6, %v413_v4  ;;  %v1287_v11 = vadd.f32 %v1286_v9, %v1285_v7  ;;  %1343 = vmatmul.mubr.bf16.vlgmr.msra.gmra.mrb[0].mxu0 (!%p1229_p10), %v724_v31 }
 0x1de   : > { %v706_v32 = vld [vmem:[#allocation2 + $0x10] sm:$0xff] (!%p1229_p10)  ;;  %1346 = vmatprep.mubr.msk.bf16.mxu0 (!%p1229_p10), %vm1911_vm0, %v1910_v14  ;;  %v712_v48 = vld [vmem:[#allocation2 + $0x40] sm:$0xff] (!%p1229_p10) }
 0x1df   : > { %694 = vst [vmem:[#allocation2 + $0x20] sm:$0xff] %v684_v10  ;;  %v685_v12 = vadd.f32 %v1287_v11, %v414_v8  ;;  %v716_v35 = vmax.f32 (!%p1229_p10), %v706_v32, 0.0  ;;  %v722_v50 = vmax.f32 (!%p1229_p10), %v712_v48, 0.0 }
 0x1e0   : > { %v707_v33 = vld [vmem:[#allocation2 + $0x18] sm:$0xff] (!%p1229_p10)  ;;  %v713_v49 = vld [vmem:[#allocation2 + $0x48] sm:$0xff] (!%p1229_p10) }
 0x1e1   : > { %695 = vst [vmem:[#allocation2 + $0x28] sm:$0xff] %v685_v12  ;;  %v717_v36 = vmax.f32 (!%p1229_p10), %v707_v33, 0.0  ;;  %v723_v51 = vmax.f32 (!%p1229_p10), %v713_v49, 0.0 }
 0x1e3   : > { %v725_v37 = vpack.c.bf16 %v717_v36, %v716_v35  ;;  %v728_v52 = vpack.c.bf16 %v723_v51, %v722_v50 }
 0x1e5   : > { %1347 = vmatmul.mubr.bf16.gmra.mrb[4].mxu0 %v725_v37 }
 0x1e6   : > { %v708_v38 = vld [vmem:[#allocation2 + $0x20] sm:$0xff]  ;;  %1350 = vmatprep.mubr.msk.bf16.mxu0 %vm1911_vm0, %v1910_v14 }
 0x1e7   : > { %v718_v40 = vmax.f32 %v708_v38, 0.0  ;;  %v1239_v38 = vld [vmem:[%s2529_s3] ss:$0 sm:$0xff] }
 0x1e8   : > { %v709_v39 = vld [vmem:[#allocation2 + $0x28] sm:$0xff] }
 0x1e9   : > { %v719_v41 = vmax.f32 %v709_v39, 0.0 }
 0x1eb   : > { %v726_v42 = vpack.c.bf16 %v719_v41, %v718_v40 }
 0x1ed   : > { %1351 = vmatmul.mubr.bf16.gmra.mrb[8].mxu0 %v726_v42 }
 0x1ee   : > { %1354 = vmatprep.mubr.msk.bf16.mxu0 %vm1911_vm0, %v1910_v14 }
 0x1f5   : > { %1355 = vmatmul.mubr.bf16.gmra.mrb[12].mxu0 %v727_v47 }
 0x1f6   : > { %1358 = vmatprep.mubr.msk.bf16.mxu0 %vm1911_vm0, %v1910_v14 }
 0x1fd   : > { %1359 = vmatmul.mubr.bf16.gmra.mrb[16].mxu0 %v728_v52 }
 0x2b0   : > { %v834_v56 = vpop.f32.mrb[0].mxu0 }
 0x2b1   : > { %v835_v57 = vadd.f32 %v1230_v55, %v834_v56  ;;  %v1344_v58 = vpop.f32.mrb[1].mxu0 }
 0x2b2   : > { %v837_v59 = vpop.f32.mrb[2].mxu0 }
 0x2b3   : > { %v838_v60 = vadd.f32 %v1230_v55, %v837_v59  ;;  %v1345_v61 = vpop.f32.mrb[3].mxu0  ;;  %v873_v62 = vmax.f32 %v835_v57, 0.0 }
 0x2b5   : > { %v874_v63 = vmax.f32 %v838_v60, 0.0 }
 0x2b7   : > { %v883_v0 = vpack.c.bf16 %v874_v63, %v873_v62 }
 0x2b8   : > { %v842_v1 = vpop.f32.mrb[4].mxu0 }
 0x2b9   : > { %v843_v2 = vadd.f32 %v1230_v55, %v842_v1  ;;  %v1348_v3 = vpop.f32.mrb[5].mxu0  ;;  %1379 = vmatmul.mubr.bf16.vlgmr.msra.gmra.mrb[0].mxu1 %v883_v0 }
 0x2ba   : > { %v845_v4 = vpop.f32.mrb[6].mxu0  ;;  %1382 = vmatprep.mubr.msk.bf16.mxu1 %vm1911_vm0, %v1910_v14 }
 0x2bb   : > { %v846_v5 = vadd.f32 %v1230_v55, %v845_v4  ;;  %v1349_v6 = vpop.f32.mrb[7].mxu0  ;;  %v875_v7 = vmax.f32 %v843_v2, 0.0 }
 0x2bd   : > { %v876_v8 = vmax.f32 %v846_v5, 0.0 }
 0x2bf   : > { %v884_v9 = vpack.c.bf16 %v876_v8, %v875_v7 }
 0x2c0   : > { %v850_v10 = vpop.f32.mrb[8].mxu0 }
 0x2c1   : > { %v851_v11 = vadd.f32 %v1230_v55, %v850_v10  ;;  %v1352_v12 = vpop.f32.mrb[9].mxu0  ;;  %1383 = vmatmul.mubr.bf16.gmra.mrb[4].mxu1 %v884_v9 }
 0x2c2   : > { %v853_v13 = vpop.f32.mrb[10].mxu0  ;;  %1386 = vmatprep.mubr.msk.bf16.mxu1 %vm1911_vm0, %v1910_v14 }
 0x2c3   : > { %v854_v15 = vadd.f32 %v1230_v55, %v853_v13  ;;  %v1353_v16 = vpop.f32.mrb[11].mxu0  ;;  %v877_v17 = vmax.f32 %v851_v11, 0.0 }
 0x2c5   : > { %v878_v18 = vmax.f32 %v854_v15, 0.0 }
 0x2c7   : > { %v885_v19 = vpack.c.bf16 %v878_v18, %v877_v17 }
 0x2c8   : > { %v858_v20 = vpop.f32.mrb[12].mxu0 }
 0x2c9   : > { %v859_v21 = vadd.f32 %v1230_v55, %v858_v20  ;;  %v1356_v22 = vpop.f32.mrb[13].mxu0  ;;  %1387 = vmatmul.mubr.bf16.gmra.mrb[8].mxu1 %v885_v19 }
 0x2ca   : > { %v861_v23 = vpop.f32.mrb[14].mxu0  ;;  %1390 = vmatprep.mubr.msk.bf16.mxu1 %vm1911_vm0, %v1910_v14 }
 0x2cb   : > { %v862_v24 = vadd.f32 %v1230_v55, %v861_v23  ;;  %v1357_v25 = vpop.f32.mrb[15].mxu0  ;;  %v879_v26 = vmax.f32 %v859_v21, 0.0 }
 0x2cd   : > { %v880_v27 = vmax.f32 %v862_v24, 0.0 }
 0x2cf   : > { %v886_v28 = vpack.c.bf16 %v880_v27, %v879_v26 }
 0x2d0   : > { %v866_v29 = vpop.f32.mrb[16].mxu0 }
 0x2d1   : > { %v867_v30 = vadd.f32 %v1230_v55, %v866_v29  ;;  %v1360_v31 = vpop.f32.mrb[17].mxu0  ;;  %1391 = vmatmul.mubr.bf16.gmra.mrb[12].mxu1 %v886_v28 }
 0x2d2   : > { %v869_v32 = vpop.f32.mrb[18].mxu0  ;;  %1394 = vmatprep.mubr.msk.bf16.mxu1 %vm1911_vm0, %v1910_v14 }
 0x2d3   : > { %v870_v33 = vadd.f32 %v1230_v55, %v869_v32  ;;  %v1361_v34 = vpop.f32.mrb[19].mxu0  ;;  %v881_v35 = vmax.f32 %v867_v30, 0.0 }
 0x2d5   : > { %v882_v36 = vmax.f32 %v870_v33, 0.0 }
 0x2d7   : > { %v887_v37 = vpack.c.bf16 %v882_v36, %v881_v35 }
 0x2d9   : > { %1395 = vmatmul.mubr.bf16.gmra.mrb[16].mxu1 %v887_v37 }
 0x38c   : > { %v993_v39 = vpop.f32.mrb[0].mxu1 }
 0x38d   : > { %v994_v40 = vadd.f32 %v1239_v38, %v993_v39  ;;  %v1380_v41 = vpop.f32.mrb[1].mxu1 }
 0x38e   : > { %v996_v42 = vpop.f32.mrb[2].mxu1 }
 0x38f   : > { %1032 = vst [vmem:[%s2288_s30] sm:$0xff] %v994_v40  ;;  %v997_v43 = vadd.f32 %v1239_v38, %v996_v42  ;;  %v1381_v14 = vpop.f32.mrb[3].mxu1 }
 0x391   : > { %1033 = vst [vmem:[%s2288_s30 + $0x8] sm:$0xff] %v997_v43 }
 0x394   : > { %v1001_v44 = vpop.f32.mrb[4].mxu1 }
 0x395   : > { %v1002_v45 = vadd.f32 %v1239_v38, %v1001_v44  ;;  %v1384_v46 = vpop.f32.mrb[5].mxu1 }
 0x396   : > { %v1004_v47 = vpop.f32.mrb[6].mxu1 }
 0x397   : > { %1034 = vst [vmem:[%s2288_s30 + $0x10] sm:$0xff] %v1002_v45  ;;  %v1005_v48 = vadd.f32 %v1239_v38, %v1004_v47  ;;  %v1385_v49 = vpop.f32.mrb[7].mxu1 }
 0x399   : > { %1035 = vst [vmem:[%s2288_s30 + $0x18] sm:$0xff] %v1005_v48 }
 0x39c   : > { %v1009_v50 = vpop.f32.mrb[8].mxu1 }
 0x39d   : > { %v1010_v51 = vadd.f32 %v1239_v38, %v1009_v50  ;;  %v1388_v52 = vpop.f32.mrb[9].mxu1 }
 0x39e   : > { %v1012_v53 = vpop.f32.mrb[10].mxu1 }
 0x39f   : > { %1036 = vst [vmem:[%s2288_s30 + $0x20] sm:$0xff] %v1010_v51  ;;  %v1013_v54 = vadd.f32 %v1239_v38, %v1012_v53  ;;  %v1389_v55 = vpop.f32.mrb[11].mxu1 }
 0x3a1   : > { %1037 = vst [vmem:[%s2288_s30 + $0x28] sm:$0xff] %v1013_v54 }
 0x3a4   : > { %v1017_v56 = vpop.f32.mrb[12].mxu1 }
 0x3a5   : > { %v1018_v57 = vadd.f32 %v1239_v38, %v1017_v56  ;;  %v1392_v58 = vpop.f32.mrb[13].mxu1 }
 0x3a6   : > { %v1020_v59 = vpop.f32.mrb[14].mxu1 }
 0x3a7   : > { %1038 = vst [vmem:[%s2288_s30 + $0x30] sm:$0xff] %v1018_v57  ;;  %v1021_v60 = vadd.f32 %v1239_v38, %v1020_v59  ;;  %v1393_v61 = vpop.f32.mrb[15].mxu1 }
 0x3a9   : > { %1039 = vst [vmem:[%s2288_s30 + $0x38] sm:$0xff] %v1021_v60 }
 0x3ac   : > { %v1025_v62 = vpop.f32.mrb[16].mxu1 }
 0x3ad   : > { %v1026_v63 = vadd.f32 %v1239_v38, %v1025_v62  ;;  %v1396_v0 = vpop.f32.mrb[17].mxu1 }
 0x3ae   : > { %v1028_v1 = vpop.f32.mrb[18].mxu1 }
 0x3af   : > { %1040 = vst [vmem:[%s2288_s30 + $0x40] sm:$0xff] %v1026_v63  ;;  %v1029_v2 = vadd.f32 %v1239_v38, %v1028_v1  ;;  %v1397_v3 = vpop.f32.mrb[19].mxu1 }
 0x3b1   : > { %1041 = vst [vmem:[%s2288_s30 + $0x48] sm:$0xff] %v1029_v2 }
 0x3b2 PF: > { %s2530_s17 = sld [smem:[#allocation19_spill]]  ;;  %s2531_s5 = sld [smem:[#allocation21_spill]] }
 0x3b3   : > { %s1056_s7 = sshll.u32 %s2288_s30, 4  ;;  %s2532_s21 = sld [smem:[#allocation32_spill]]  ;;  %s2380_s7 = int_to_ptr.vmem [resolvable:$true] %s1056_s7 }
 0x3b4   : > { %s2384_s16 = scalar_lea.sflag [#allocation5], %s380_s18  ;;  %s1741_s23 = scalar_lea.vmem %s2380_s7, 1280 }
 0x3b5   : > { %p1742_p0 = scmp.ne.s32.totalorder %s2380_s7, %s1741_s23  ;;  %s1912_s27 = smov [#allocation11]  }
 0x3b6   : > { %s1745_s30 = sshll.u32 %s1912_s27, 4  ;;  %s1746_s30 = int_to_ptr.vmem [resolvable:$false] %s1745_s30 }
 0x3b7   : > { %s1747_s15 = scalar_lea.vmem %s1746_s30, 2560  ;;  %p1748_p12 = scmp.lt.s32.totalorder %s2380_s7, %s1746_s30 }
 0x3b8   : > { %s1253_s24 = smul.u32 1280, %s2530_s17  ;;  %p2533_p9 = scmp.ne.s32.totalorder %s2531_s5, 0 }
 0x3b9   : > { %p1749_p5 = scmp.lt.s32.totalorder %s1747_s15, %s1741_s23 }
 0x3ba   : > { %s2378_s19 = scalar_lea.hbm %s2532_s21, %s1253_s24  ;;  %p1743_p13 = pnand %p1742_p0, %p2533_p9 }
 0x3bb   : > { %p1750_p4 = por %p1749_p5, %p1748_p12 }
 0x3bc   : > { %p1744_p8 = pneg %p1743_p13 }
 0x3be   : > { %p1751_p7 = pnand %p1750_p4, %p1744_p8 }
 0x3c0   : > { %1754 = shalt.err (!%p1751_p7)
}
 0x3c1   : > { %s1755_s18 = scalar_lea.hbm %s2378_s19, 1280  ;;  %s1759_s10 = scalar_lea.hbm %s2532_s21, 2560 }
 0x3c2   : > { %p1756_p6 = scmp.ne.s32.totalorder %s2378_s19, %s1755_s18  ;;  %p1760_p3 = scmp.lt.u32.totalorder %s2378_s19, %s2532_s21 }
 0x3c3   : > { %p1761_p11 = scmp.lt.u32.totalorder %s1759_s10, %s1755_s18  ;;  %p1763_p0 = scmp.lt.u32.totalorder %s1755_s18, %s2378_s19 }
 0x3c4   : > { %p1757_p1 = pnand %p1756_p6, %p2533_p9 }
 0x3c5   : > { %p1762_p10 = por %p1761_p11, %p1760_p3 }
 0x3c6   : > { %p1758_p2 = pneg %p1757_p1 }
 0x3c7   : > { %p1764_p13 = por %p1763_p0, %p1762_p10 }
 0x3c9   : > { %p1765_p8 = pnand %p1764_p13, %p1758_p2 }
 0x3cb   : > { %1768 = shalt.err (!%p1765_p8)
}
 0x3cc   : > { %s1913_s3 = smov 128   ;;  %s1914_s17 = smov 8  }
 0x3cd   : > { %1429 = dma.vmem_to_hbm [thread:$0]  (%p2533_p9), %s2380_s7, 1280, %s2378_s19, %s2384_s16, %s1913_s3, %s1913_s3, %s1914_s17  }
 0x3ce PF: > { %s2534_s24 = sld [smem:[#allocation17_spill]]  ;;  %s2535_s22 = sld [smem:[#allocation22_spill]] }
 0x3cf   : > { %p1454_p12 = scmp.ge.s32.totalorder %s1899_s14, 2 }
 0x3d4   : > { %s1071_s6 = sand.u32 1, %s2534_s24   ;;  %p2536_p5 = scmp.ne.s32.totalorder %s2535_s22, 0 }
 0x3d5   : > { %s1072_s23 = scalar_lea.sflag [#allocation5], %s1071_s6 }
 0x3d6   : > { %p1446_p4 = pnand %p1454_p12, %p2536_p5 }
 0x3d8   : > { %1842 = dma.done.wait (!%p1446_p4), %s1072_s23, 1280  }
 0x3d9   : > { %1844 = vsyncadd (!%p1446_p4), %s1072_s23, 4294966016  ;;  %s27_s14 = sadd.s32 1, %s1899_s14   ;;  %s2538_s5 = sld [smem:[#allocation25_spill]] }
 0x3da   : > { %p2413_p7 = scmp.ge.s32.totalorder %s27_s14, 10   ;;  %s2539_s7 = sld [smem:[#allocation20_spill]] }
 0x3db   : > { %s2540_s19 = sld [smem:[#allocation23_spill]]  ;;  %s2541_s13 = sld [smem:[#allocation24_spill]] }
 0x3dc   : > { %s2543_s24 = smov %s1851_s25  ;;  %s2544_s25 = smov %s1855_s26 }
 0x3dd   : > { %s2545_s26 = smov %s2154_s4  ;;  %s2546_s27 = smov %s1863_s28 }
 0x3de   : > { %s2547_s28 = smov %s1867_s29  ;;  %s2548_s29 = smov %s2210_s11 }
 0x3df   : > { %s2549_s30 = smov %s1875_s8  ;;  %s2550_s8 = smov %s1879_s9 }
 0x3e0   : > { %s2551_s9 = smov %s2538_s5  ;;  %s2552_s10 = smov %s1891_s12 }
 0x3e1   : > { %s2553_s11 = smov %s2539_s7  ;;  %s2554_s12 = smov %s2540_s19 }
 0x3e2   :  { %26 = sbr.rel (!%p2413_p7) target bundleno = 21 (0x15), region = 122 }
 0x3e9   :  { %1077 = vsyncpa [#allocation4], 1 }
 0x3ea   :  { %1079 = vsyncpa [#allocation4 + $0x1], 1 }
 0x3eb   :  { %1080 = vsyncpa [#allocation7], 1 }
 0x3ec   :  { %1082 = vsyncpa [#allocation7 + $0x1], 1 }
 0x3ed   :  { %1083 = vsyncpa [#allocation10], 1 }
 0x3ee   :  { %1084 = vsyncpa [#allocation5], 1 }
 0x3ef   :  { %1086 = vsyncpa [#allocation5 + $0x1], 1 }

</bundles_post_ra>
